<compile_context>
chip_gen: v7x
topology: tpu7x:2x2x1
jax: 0.10.0
libtpu: 0.0.40
codegen_flags: <defaults>
</compile_context>

<pallas_src>
import jax
import jax.numpy as jnp
from jax.experimental import pallas as pl
from jax.experimental.pallas import tpu as pltpu

_MIB = 1024 * 1024


def _mish_kernel(x_ref, o_ref):
    x = x_ref[...].astype(jnp.float32)
    # mish(x) = x * tanh(softplus(x)).  With u = exp(-|x|) (always in [0,1]):
    #   x >= 0: tanh(softplus(x)) = (1 + 2u)   / (1 + 2u + 2u^2)
    #   x <  0: tanh(softplus(x)) = (2u + u^2) / (2 + 2u + u^2)
    # Large |x| is safe: u -> 0 gives ratio -> 1 (x>=0) or -> u (x<0).
    u = jnp.exp(-jnp.abs(x))
    u2 = u * u
    pos = x >= 0.0
    num = jnp.where(pos, 1.0 + 2.0 * u, 2.0 * u + u2)
    den = jnp.where(pos, 1.0 + 2.0 * u + 2.0 * u2, 2.0 + 2.0 * u + u2)
    # Exact reciprocal keeps 1e-5 tolerances; the kernel is HBM-bound so the
    # extra VPU work is hidden under the DMA stream.
    # TODO(synk): if this is ever fused into a compute-bound region, switch to
    # pl.reciprocal(den, approx=True) + one Newton step (idle EUP slot).
    y = x * num * pl.reciprocal(den)
    o_ref[...] = y.astype(o_ref.dtype)


def _pick_width(n):
    # Widest lane-dense last dim (multiple of 128) that divides n exactly.
    for w in (2048, 1024, 512, 256, 128):
        if n % w == 0:
            return w
    return None


def _sublane_multiple(dtype):
    itemsize = jnp.dtype(dtype).itemsize
    if itemsize >= 4:
        return 8
    if itemsize == 2:
        return 16
    return 32


def _hw_params():
    """Generation-aware block-size / VMEM-budget / TensorCore-count heuristics."""
    vmem_bytes = 64 * _MIB  # conservative default (v7x per-TC size)
    try:
        info = pltpu.get_tpu_info()
        vmem_bytes = int(getattr(info, "vmem_capacity_bytes", vmem_bytes))
    except Exception:
        pass
    if vmem_bytes <= 96 * _MIB:
        # v7x-like: 64 MiB VMEM per TC, 2 TensorCores, ~3.2 TB/s HBM.
        return dict(target_block_bytes=8 * _MIB, vmem_cap=48 * _MIB,
                    multi_tc=True)
    # v5e / v6e: 128 MiB VMEM, 1 TensorCore.
    return dict(target_block_bytes=12 * _MIB, vmem_cap=80 * _MIB,
                multi_tc=False)


def mish(x, *, target_block_bytes=None):
    """Elementwise Mish over an array of any (float) shape/dtype."""
    orig_shape = x.shape
    orig_dtype = x.dtype
    n = x.size
    if n == 0:
        return x

    hw = _hw_params()
    if target_block_bytes is None:
        target_block_bytes = hw["target_block_bytes"]

    itemsize = jnp.dtype(orig_dtype).itemsize
    width = _pick_width(n)

    if width is None:
        # Rare fallback: flat size not a multiple of 128.  Use a 1-D blocked
        # kernel; Pallas masks the ragged last block on store, so there is no
        # jnp.pad / post-slice (no extra HBM read+write passes).
        x_flat = jnp.ravel(x)
        blk = n if n <= 128 * 1024 else 128 * 1024
        grid = (pl.cdiv(n, blk),)
        y_flat = pl.pallas_call(
            _mish_kernel,
            out_shape=jax.ShapeDtypeStruct((n,), orig_dtype),
            grid_spec=pltpu.PrefetchScalarGridSpec(
                num_scalar_prefetch=0,
                grid=grid,
                in_specs=[pl.BlockSpec((blk,), lambda i: (i,))],
                out_specs=pl.BlockSpec((blk,), lambda i: (i,)),
            ),
            compiler_params=pltpu.CompilerParams(
                dimension_semantics=("arbitrary",),
                vmem_limit_bytes=32 * _MIB,
            ),
        )(x_flat)
        return y_flat.reshape(orig_shape)

    rows = n // width
    sub = _sublane_multiple(orig_dtype)

    # Rows per block: ~target_block_bytes per input buffer, rounded to the
    # dtype's native sublane packing so loads/stores stay unmasked.
    target_rows = max(sub, (target_block_bytes // (width * itemsize)) // sub * sub)

    if rows > target_rows:
        tile_rows = target_rows                       # grid >= 2 automatically
    elif hw["multi_tc"] and rows > sub and n * itemsize >= 4 * _MIB:
        # Fits in one block, but on a 2-TensorCore chip keep 2 grid steps so
        # both cores get a >= ~2 MiB half.
        tile_rows = pl.cdiv(rows, 2 * sub) * sub
    else:
        # Single-TC chips (v5e/v6e) or small tensors: one grid step, one DMA.
        tile_rows = rows                              # full dim -> always valid

    grid = (pl.cdiv(rows, tile_rows),)

    block_bytes_in = tile_rows * width * itemsize
    block_bytes_f32 = tile_rows * width * 4
    # 2x input + 2x output double buffers + one block of f32 headroom.
    vmem_limit = int(min(hw["vmem_cap"],
                         max(32 * _MIB, 4 * block_bytes_in + block_bytes_f32)))

    x2d = jnp.ravel(x).reshape(rows, width)

    y2d = pl.pallas_call(
        _mish_kernel,
        out_shape=jax.ShapeDtypeStruct((rows, width), orig_dtype),
        grid_spec=pltpu.PrefetchScalarGridSpec(
            num_scalar_prefetch=0,
            grid=grid,
            in_specs=[pl.BlockSpec((tile_rows, width), lambda i: (i, 0))],
            out_specs=pl.BlockSpec((tile_rows, width), lambda i: (i, 0)),
        ),
        compiler_params=pltpu.CompilerParams(
            # TODO(synk): verify "parallel" shards the 1-D grid across both
            # TensorCores on v7x; if not, switch to pltpu.CORE_PARALLEL.
            dimension_semantics=("parallel",),
            vmem_limit_bytes=vmem_limit,
        ),
    )(x2d)
    return y2d.reshape(orig_shape)


def mish_ref(x):
    # Independent reference: stable softplus + tanh.
    xf = x.astype(jnp.float32)
    sp = jnp.maximum(xf, 0.0) + jnp.log1p(jnp.exp(-jnp.abs(xf)))
    return (xf * jnp.tanh(sp)).astype(x.dtype)


if __name__ == "__main__":
    key = jax.random.PRNGKey(0)
    k1, k2, k3, k4 = jax.random.split(key, 4)

    # Primary test: NCHW like the PyTorch module, batch=2, channels=4, 16x16.
    x1 = jax.random.normal(k1, (2, 4, 16, 16), dtype=jnp.float32) * 3.0
    y1 = jax.block_until_ready(mish(x1))
    assert y1.shape == x1.shape and y1.dtype == x1.dtype
    assert jnp.allclose(y1, mish_ref(x1), atol=1e-5, rtol=1e-5), "mismatch (base)"

    # Tiled multi-block path (forced via a small block-size override).
    x2 = jax.random.normal(k2, (8, 32, 32, 32), dtype=jnp.float32) * 3.0
    y2 = jax.block_until_ready(mish(x2, target_block_bytes=256 * 1024))
    assert jnp.allclose(y2, mish_ref(x2), atol=1e-5, rtol=1e-5), "mismatch (tiled)"

    # Fallback path: flat size (105) not a multiple of 128 -> 1-D kernel.
    x3 = jax.random.normal(k3, (3, 5, 7), dtype=jnp.float32) * 3.0
    y3 = jax.block_until_ready(mish(x3))
    assert y3.shape == x3.shape
    assert jnp.allclose(y3, mish_ref(x3), atol=1e-5, rtol=1e-5), "mismatch (ragged)"

    # bf16 path (dtype-aware sublane rounding / casts).
    x4 = (jax.random.normal(k4, (2, 4, 16, 16), dtype=jnp.float32) * 3.0
          ).astype(jnp.bfloat16)
    y4 = jax.block_until_ready(mish(x4))
    assert y4.dtype == jnp.bfloat16
    assert jnp.allclose(y4.astype(jnp.float32),
                        mish_ref(x4).astype(jnp.float32),
                        atol=2e-2, rtol=2e-2), "mismatch (bf16)"

    print("KERNEL_OK")
</pallas_src>

<mosaic_0001>
module attributes {stable_mosaic.version = 11 : i64} {
  func.func @_mish_kernel(%arg0: i32, %arg1: memref<1x2048xf32, #tpu.memory_space<vmem>>, %arg2: memref<1x2048xf32, #tpu.memory_space<vmem>>) attributes {dimension_semantics = [#tpu.dimension_semantics<parallel>], iteration_bounds = array<i64: 1>, scalar_prefetch = 0 : i64, scratch_operands = 0 : i64, tpu.core_type = #tpu.core_type<tc>, window_params = [{transform_indices = @transform_0, window_bounds = array<i64: 1, 2048>}, {transform_indices = @transform_1, window_bounds = array<i64: 1, 2048>}]} {
    %c0 = arith.constant 0 : index
    %c0_0 = arith.constant 0 : index
    %0 = vector.load %arg1[%c0, %c0_0] : memref<1x2048xf32, #tpu.memory_space<vmem>>, vector<1x2048xf32>
    %1 = math.absf %0 : vector<1x2048xf32>
    %cst = arith.constant 0.000000e+00 : f32
    %2 = vector.broadcast %cst : f32 to vector<1x2048xf32>
    %3 = arith.subf %2, %1 : vector<1x2048xf32>
    %4 = math.exp %3 : vector<1x2048xf32>
    %5 = arith.mulf %4, %4 : vector<1x2048xf32>
    %cst_1 = arith.constant 0.000000e+00 : f32
    %6 = vector.broadcast %cst_1 : f32 to vector<1x2048xf32>
    %7 = arith.cmpf oge, %0, %6 : vector<1x2048xf32>
    %cst_2 = arith.constant 2.000000e+00 : f32
    %8 = vector.broadcast %cst_2 : f32 to vector<1x2048xf32>
    %9 = arith.mulf %8, %4 : vector<1x2048xf32>
    %cst_3 = arith.constant 1.000000e+00 : f32
    %10 = vector.broadcast %cst_3 : f32 to vector<1x2048xf32>
    %11 = arith.addf %10, %9 : vector<1x2048xf32>
    %cst_4 = arith.constant 2.000000e+00 : f32
    %12 = vector.broadcast %cst_4 : f32 to vector<1x2048xf32>
    %13 = arith.mulf %12, %4 : vector<1x2048xf32>
    %14 = arith.addf %13, %5 : vector<1x2048xf32>
    %15 = arith.select %7, %11, %14 : vector<1x2048xi1>, vector<1x2048xf32>
    %cst_5 = arith.constant 2.000000e+00 : f32
    %16 = vector.broadcast %cst_5 : f32 to vector<1x2048xf32>
    %17 = arith.mulf %16, %4 : vector<1x2048xf32>
    %cst_6 = arith.constant 1.000000e+00 : f32
    %18 = vector.broadcast %cst_6 : f32 to vector<1x2048xf32>
    %19 = arith.addf %18, %17 : vector<1x2048xf32>
    %cst_7 = arith.constant 2.000000e+00 : f32
    %20 = vector.broadcast %cst_7 : f32 to vector<1x2048xf32>
    %21 = arith.mulf %20, %5 : vector<1x2048xf32>
    %22 = arith.addf %19, %21 : vector<1x2048xf32>
    %cst_8 = arith.constant 2.000000e+00 : f32
    %23 = vector.broadcast %cst_8 : f32 to vector<1x2048xf32>
    %24 = arith.mulf %23, %4 : vector<1x2048xf32>
    %cst_9 = arith.constant 2.000000e+00 : f32
    %25 = vector.broadcast %cst_9 : f32 to vector<1x2048xf32>
    %26 = arith.addf %25, %24 : vector<1x2048xf32>
    %27 = arith.addf %26, %5 : vector<1x2048xf32>
    %28 = arith.select %7, %22, %27 : vector<1x2048xi1>, vector<1x2048xf32>
    %29 = arith.mulf %0, %15 : vector<1x2048xf32>
    %30 = tpu.reciprocal %28 : vector<1x2048xf32> -> vector<1x2048xf32>
    %31 = arith.mulf %29, %30 : vector<1x2048xf32>
    %c0_10 = arith.constant 0 : index
    %c0_11 = arith.constant 0 : index
    %32 = vector.load %arg2[%c0_10, %c0_11] : memref<1x2048xf32, #tpu.memory_space<vmem>>, vector<1x2048xf32>
    tpu.vector_store %arg2[%c0_10, %c0_11], %31 {strides = array<i32>} : memref<1x2048xf32, #tpu.memory_space<vmem>>, vector<1x2048xf32>,
    return
  }
  func.func @transform_0(%arg0: i32) -> (i32, i32) {
    %c0_i32 = arith.constant 0 : i32
    %c0_i32_0 = arith.constant 0 : i32
    return %arg0, %c0_i32 : i32, i32
  }
  func.func @transform_1(%arg0: i32) -> (i32, i32) {
    %c0_i32 = arith.constant 0 : i32
    %c0_i32_0 = arith.constant 0 : i32
    return %arg0, %c0_i32 : i32, i32
  }
}

</mosaic_0001>

<bundles_post_ra>
// kernel: tpu_custom_call.1
= control target key start
LH: loop header
LB: loop body
LE: loop exit
PB: predicated region body
PF: predicated region fallthrough
CT: control target
= control target key end

     0   :  { %6 = vsyncpa [#allocation3], 0  ;;  %s170_s0 = inlined_call_operand.hbm [shape: f32[1,2048], index: 0, kind: input, shape index: {}]   ;;  %s171_s1 = inlined_call_operand.hbm [shape: f32[1,2048], index: 1, kind: output, shape index: {}]  }
   0x1   :  { %7 = vsyncpa [#allocation4], 0  ;;  %s134_s6 = smov [#allocation2]   ;;  %s86_s10 = scalar_lea.hbm %s170_s0, 256 }
   0x2   :  { %s14_s7 = sshll.u32 %s134_s6, 4  ;;  %p87_p0 = scmp.ne.s32.totalorder %s170_s0, %s86_s10  ;;  %s15_s7 = int_to_ptr.vmem [resolvable:$true] %s14_s7 }
   0x3   :  { %p90_p1 = scmp.lt.u32.totalorder %s86_s10, %s170_s0 }
   0x5   :  { %p92_p2 = pnand %p90_p1, %p87_p0 }
   0x7   :  { %95 = shalt.err (!%p92_p2)
}
   0x8   :  { %s96_s15 = scalar_lea.vmem %s15_s7, 256  ;;  %p101_p4 = scmp.lt.s32.totalorder %s15_s7, %s15_s7 }
   0x9   :  { %p97_p3 = scmp.ne.s32.totalorder %s15_s7, %s96_s15  ;;  %p102_p5 = scmp.lt.s32.totalorder %s96_s15, %s96_s15 }
   0xb   :  { %p103_p6 = por %p102_p5, %p101_p4 }
   0xd   :  { %p104_p7 = pnand %p103_p6, %p97_p3 }
   0xf   :  { %107 = shalt.err (!%p104_p7)
}
  0x10   :  { %17 = dma.hbm_to_vmem [thread:$0]  %s170_s0, 256, %s15_s7, [#allocation3]  }
  0x11   :  { %130 = dma.done.wait [#allocation3], 256  }
  0x12   :  { %131 = vsyncadd [#allocation3], 4294967040  ;;  %v21_v0 = vld [vmem:[#allocation2] sm:$0xff]  ;;  %v22_v1 = vld [vmem:[#allocation2 + $0x8] sm:$0xff]  ;;  %s135_s0 = smov [#allocation5]  }
  0x13   :  { %v23_v2 = vand.u32 2147483647, %v21_v0  ;;  %v24_v3 = vand.u32 2147483647, %v22_v1  ;;  %vm33_vm0 = vcmp.ge.f32.partialorder %v21_v0, 0.0  ;;  %vm34_vm1 = vcmp.ge.f32.partialorder %v22_v1, 0.0 }
  0x14   :  { %s67_s18 = sshll.u32 %s135_s0, 4  ;;  %s68_s18 = int_to_ptr.vmem [resolvable:$true] %s67_s18 }
  0x15   :  { %v25_v4 = vsub.f32 0.0, %v23_v2  ;;  %v26_v5 = vsub.f32 0.0, %v24_v3  ;;  %s108_s19 = scalar_lea.vmem %s68_s18, 256  ;;  %p113_p9 = scmp.lt.s32.totalorder %s68_s18, %s68_s18 }
  0x16   :  { %p109_p8 = scmp.ne.s32.totalorder %s68_s18, %s108_s19  ;;  %p114_p10 = scmp.lt.s32.totalorder %s108_s19, %s108_s19 }
  0x17   :  { %v27_v6 = vmul.f32 1.442695, %v25_v4  ;;  %v29_v7 = vmul.f32 1.442695, %v26_v5 }
  0x18   :  { %p115_p11 = por %p114_p10, %p113_p9 }
  0x19   :  { %78 = vpow2.f32 %v27_v6 }
  0x1a   :  { %80 = vpow2.f32 %v29_v7  ;;  %p116_p12 = pnand %p115_p11, %p109_p8 }
  0x23   :  { %v79_v8 = vpop.eup %78 }
  0x24   :  { %v81_v9 = vpop.eup %80  ;;  %v31_v10 = vmul.f32 %v79_v8, %v79_v8  ;;  %v35_v11 = vmul.f32 2.0, %v79_v8 }
  0x25   :  { %v32_v12 = vmul.f32 %v81_v9, %v81_v9  ;;  %v36_v13 = vmul.f32 2.0, %v81_v9 }
  0x26   :  { %v37_v14 = vadd.f32 1.0, %v35_v11  ;;  %v43_v15 = vmul.f32 2.0, %v31_v10  ;;  %v47_v16 = vadd.f32 2.0, %v35_v11  ;;  %v39_v25 = vadd.f32 %v35_v11, %v31_v10 }
  0x27   :  { %v38_v17 = vadd.f32 1.0, %v36_v13  ;;  %v44_v18 = vmul.f32 2.0, %v32_v12  ;;  %v48_v19 = vadd.f32 2.0, %v36_v13  ;;  %v40_v27 = vadd.f32 %v36_v13, %v32_v12 }
  0x28   :  { %v45_v20 = vadd.f32 %v43_v15, %v37_v14  ;;  %v49_v21 = vadd.f32 %v47_v16, %v31_v10  ;;  %v41_v28 = vsel %vm33_vm0, %v37_v14, %v39_v25 }
  0x29   :  { %v46_v22 = vadd.f32 %v44_v18, %v38_v17  ;;  %v50_v23 = vadd.f32 %v48_v19, %v32_v12  ;;  %v42_v29 = vsel %vm34_vm1, %v38_v17, %v40_v27  ;;  %v53_v30 = vmul.f32 %v41_v28, %v21_v0 }
  0x2a   :  { %v51_v24 = vsel %vm33_vm0, %v45_v20, %v49_v21  ;;  %v54_v31 = vmul.f32 %v42_v29, %v22_v1 }
  0x2b   :  { %82 = vrcp.f32 %v51_v24  ;;  %v52_v26 = vsel %vm34_vm1, %v46_v22, %v50_v23 }
  0x2c   :  { %84 = vrcp.f32 %v52_v26 }
  0x35   :  { %v83_v32 = vpop.eup %82 }
  0x36   :  { %v85_v33 = vpop.eup %84  ;;  %v57_v34 = vmul.f32 %v83_v32, %v53_v30 }
  0x37   :  { %v58_v35 = vmul.f32 %v85_v33, %v54_v31 }
  0x38   :  { %59 = vst [vmem:[#allocation5] sm:$0xff] %v57_v34 }
  0x39   :  { %60 = vst [vmem:[#allocation5 + $0x8] sm:$0xff] %v58_v35 }
  0x3a   :  { %119 = shalt.err (!%p116_p12)
}
  0x3b   :  { %s120_s22 = scalar_lea.hbm %s171_s1, 256 }
  0x3c   :  { %p121_p13 = scmp.ne.s32.totalorder %s171_s1, %s120_s22  ;;  %p124_p0 = scmp.lt.u32.totalorder %s120_s22, %s171_s1 }
  0x3e   :  { %p126_p1 = pnand %p124_p0, %p121_p13 }
  0x40   :  { %129 = shalt.err (!%p126_p1)
}
  0x41   :  { %70 = dma.vmem_to_hbm [thread:$0]  %s68_s18, 256, %s171_s1, [#allocation4]  }
  0x42   :  { %132 = dma.done.wait [#allocation4], 256  }
  0x43   :  { %133 = vsyncadd [#allocation4], 4294967040 }
  0x44   :  { %74 = vsyncpa [#allocation3], 1 }
  0x45   :  { %75 = vsyncpa [#allocation4], 1 }

</bundles_post_ra>
